<compile_context>
chip_gen: v6e
topology: v6e:2x2x1
jax: 0.10.0
libtpu: 0.0.40
codegen_flags: <defaults>
</compile_context>

<pallas_src>
import jax
import jax.numpy as jnp
from jax.experimental import pallas as pl
from jax.experimental.pallas import tpu as pltpu


_NEG_LARGE = -1e30      # bias for padded output columns (exp -> 0 in the stats)


def _detect_config():
    """Per-generation VMEM budget / tile defaults / reduction-split count."""
    try:
        kind = jax.devices()[0].device_kind.lower()
    except Exception:
        kind = ""
    is_v7 = ("v7" in kind) or ("7x" in kind) or ("tpu7" in kind)
    if is_v7:
        # 64 MiB physical VMEM, 2 TensorCores per chip.
        return dict(vmem_limit=48 * 1024 * 1024,
                    tile_f32=16384, tile_bf16=32768, num_splits=2)
    # v5e / v6e: 128 MiB VMEM, 1 TensorCore per chip.
    return dict(vmem_limit=100 * 1024 * 1024,
                tile_f32=32768, tile_bf16=65536, num_splits=1)


# --------------------------------------------------------------------------
# Kernel A: partial[p] = sum_k x[:, k-th tile] @ w1[k-th tile, :]
# grid = (num_splits, nk_per): the IN reduction is split into independent
# partial sums (leading "parallel" axis -> both v7x TensorCores stream their
# half of w1); each partial accumulates directly into its output block across
# the trailing "arbitrary" axis (no scratch).
# --------------------------------------------------------------------------
def _partial_hidden_kernel(x_ref, w1_ref, acc_ref):
    @pl.when(pl.program_id(1) == 0)
    def _init():
        acc_ref[...] = jnp.zeros_like(acc_ref)

    acc_ref[...] += jnp.dot(x_ref[...], w1_ref[...],
                            preferred_element_type=jnp.float32)[None]


# --------------------------------------------------------------------------
# Kernel B: per-output-tile logits = h @ w4[:, tile] + b4[tile]
#           plus per-tile softmax stats (row max, row sum-exp).
# grid = (nj,) over output-feature tiles -- fully parallel (no carried state).
# --------------------------------------------------------------------------
def _logits_kernel(h_ref, w4_ref, b4_ref, logits_ref, m_ref, l_ref):
    logits = jnp.dot(h_ref[...], w4_ref[...],
                     preferred_element_type=jnp.float32) + b4_ref[...]
    logits_ref[...] = logits.astype(logits_ref.dtype)
    m = jnp.max(logits, axis=1, keepdims=True)                  # (B, 1)
    l = jnp.sum(jnp.exp(logits - m), axis=1, keepdims=True)     # (B, 1)
    m_ref[...] = m[None]                                        # (1, B, 1)
    l_ref[...] = l[None]


# --------------------------------------------------------------------------
# Kernel C: out = logits - logsumexp (second pass over the logits).
# Writes the true (B, OUT) width (Pallas edge-masks the ragged last tile), so
# no post-slice copy; aliased in place onto the logits buffer when possible.
# --------------------------------------------------------------------------
def _normalize_kernel(logits_ref, lse_ref, out_ref):
    out_ref[...] = logits_ref[...].astype(jnp.float32) - lse_ref[...]


def _round_tile(t, full, align=128):
    """Clamp tile to `full`; if smaller, round down to a multiple of `align`."""
    t = min(t, full)
    if t < full:
        t = max(align, (t // align) * align)
        t = min(t, full)
    return t


def network_forward(x, params, *, tk=None, tn=None,
                    weight_dtype=jnp.bfloat16, logits_dtype=jnp.float32,
                    num_splits=None):
    """x: (B, IN) float32.  params: (w1,b1,w2,b2,w3,b3,w4,b4).

    Weights are stored as (in_features, out_features) (transpose of
    torch.nn.Linear.weight); biases are (1, out_features) float32.
    """
    w1, b1, w2, b2, w3, b3, w4, b4 = params
    B, IN = x.shape
    H = w1.shape[1]
    OUT = w4.shape[1]

    cfg = _detect_config()
    wdt = jnp.dtype(weight_dtype) if weight_dtype is not None else w1.dtype
    is_half = jnp.dtype(wdt).itemsize < 4

    if tk is None:
        tk = cfg["tile_bf16"] if is_half else cfg["tile_f32"]
    if tn is None:
        tn = cfg["tile_bf16"] if is_half else cfg["tile_f32"]
    if num_splits is None:
        num_splits = cfg["num_splits"]
    vmem_limit = cfg["vmem_limit"]

    # Stream the large operands at the requested dtype; MXU accumulates in f32.
    x = x.astype(wdt)
    w1 = w1.astype(wdt)
    w2 = w2.astype(wdt)
    w3 = w3.astype(wdt)
    w4 = w4.astype(wdt)

    tk = _round_tile(tk, IN)
    tn = _round_tile(tn, OUT)

    nk_total = pl.cdiv(IN, tk)
    num_splits = max(1, min(int(num_splits), nk_total))
    nk_per = pl.cdiv(nk_total, num_splits)
    in_p = num_splits * nk_per * tk

    nj = pl.cdiv(OUT, tn)
    out_p = nj * tn

    if in_p != IN:                       # zero-pad input features (no-op terms)
        x = jnp.pad(x, ((0, 0), (0, in_p - IN)))
        w1 = jnp.pad(w1, ((0, in_p - IN), (0, 0)))
    if out_p != OUT:                     # pad output features; exp(pad bias)==0
        w4 = jnp.pad(w4, ((0, 0), (0, out_p - OUT)))
        b4 = jnp.pad(b4, ((0, 0), (0, out_p - OUT)),
                     constant_values=_NEG_LARGE)

    # ---- Kernel A: split partial accumulators of x @ w1 --------------------
    partial = pl.pallas_call(
        _partial_hidden_kernel,
        out_shape=jax.ShapeDtypeStruct((num_splits, B, H), jnp.float32),
        grid_spec=pltpu.PrefetchScalarGridSpec(
            num_scalar_prefetch=0,
            grid=(num_splits, nk_per),
            in_specs=[
                pl.BlockSpec((B, tk), lambda p, k: (0, p * nk_per + k)),
                pl.BlockSpec((tk, H), lambda p, k: (p * nk_per + k, 0)),
            ],
            out_specs=pl.BlockSpec((1, B, H), lambda p, k: (p, 0, 0)),
        ),
        compiler_params=pltpu.CompilerParams(
            dimension_semantics=("parallel", "arbitrary"),
            vmem_limit_bytes=vmem_limit),
    )(x, w1)

    # Tiny 128-wide epilogue in plain XLA (b1/ReLU, hl1, hl2); negligible next
    # to the w1/w4 HBM streams and keeps Kernel A fully parallel over splits.
    acc = jnp.sum(partial, axis=0)                                   # (B, H)
    h = jnp.maximum(acc + b1, 0.0)
    h = jnp.maximum(jnp.dot(h.astype(wdt), w2,
                            preferred_element_type=jnp.float32) + b2, 0.0)
    h = jnp.maximum(jnp.dot(h.astype(wdt), w3,
                            preferred_element_type=jnp.float32) + b3, 0.0)
    h = h.astype(wdt)

    # ---- Kernel B: logits tiles + per-tile softmax stats --------------------
    logits, m_part, l_part = pl.pallas_call(
        _logits_kernel,
        out_shape=(
            jax.ShapeDtypeStruct((B, out_p), jnp.dtype(logits_dtype)),
            jax.ShapeDtypeStruct((nj, B, 1), jnp.float32),
            jax.ShapeDtypeStruct((nj, B, 1), jnp.float32),
        ),
        grid_spec=pltpu.PrefetchScalarGridSpec(
            num_scalar_prefetch=0,
            grid=(nj,),
            in_specs=[
                pl.BlockSpec((B, H), lambda j: (0, 0)),      # h (resident)
                pl.BlockSpec((H, tn), lambda j: (0, j)),     # w4, tiled
                pl.BlockSpec((1, tn), lambda j: (0, j)),     # b4, tiled
            ],
            out_specs=(
                pl.BlockSpec((B, tn), lambda j: (0, j)),        # logits tile
                pl.BlockSpec((1, B, 1), lambda j: (j, 0, 0)),   # per-tile max
                pl.BlockSpec((1, B, 1), lambda j: (j, 0, 0)),   # per-tile sumexp
            ),
        ),
        compiler_params=pltpu.CompilerParams(
            dimension_semantics=("parallel",),
            vmem_limit_bytes=vmem_limit),
    )(h, w4, b4)

    # Tiny O(nj * B) XLA combine -> global logsumexp (keeps the OUT axis
    # "parallel" for megacore).  Padded-only tiles contribute exactly 0.
    g = jnp.max(m_part, axis=0)                                        # (B, 1)
    lse = g + jnp.log(jnp.sum(l_part * jnp.exp(m_part - g), axis=0))   # (B, 1)

    # ---- Kernel C: log_softmax normalization --------------------------------
    aliases = {}
    if out_p == OUT and jnp.dtype(logits_dtype) == jnp.float32:
        aliases = {0: 0}              # normalize the logits buffer in place

    out = pl.pallas_call(
        _normalize_kernel,
        out_shape=jax.ShapeDtypeStruct((B, OUT), jnp.float32),
        grid_spec=pltpu.PrefetchScalarGridSpec(
            num_scalar_prefetch=0,
            grid=(nj,),
            in_specs=[
                pl.BlockSpec((B, tn), lambda j: (0, j)),
                pl.BlockSpec((B, 1), lambda j: (0, 0)),
            ],
            out_specs=pl.BlockSpec((B, tn), lambda j: (0, j)),
        ),
        input_output_aliases=aliases,
        compiler_params=pltpu.CompilerParams(
            dimension_semantics=("parallel",),
            vmem_limit_bytes=vmem_limit),
    )(logits, lse)

    return out


def init_params(key, in_dim, hidden, out_dim):
    """Deterministic init matching PyTorch Linear's U(-1/sqrt(fan_in), +)."""
    dims = [(in_dim, hidden), (hidden, hidden), (hidden, hidden),
            (hidden, out_dim)]
    params = []
    for i, (fi, fo) in enumerate(dims):
        kw, kb = jax.random.split(jax.random.fold_in(key, i))
        bound = 1.0 / jnp.sqrt(jnp.asarray(fi, jnp.float32))
        w = jax.random.uniform(kw, (fi, fo), jnp.float32, -bound, bound)
        b = jax.random.uniform(kb, (1, fo), jnp.float32, -bound, bound)
        params += [w, b]
    return tuple(params)


def reference_forward(x, params, weight_dtype=None):
    """Pure-JAX reference mirroring the kernel's (optional) low-precision casts."""
    w1, b1, w2, b2, w3, b3, w4, b4 = params
    wdt = jnp.dtype(weight_dtype) if weight_dtype is not None else w1.dtype

    def c(a):
        return a.astype(wdt).astype(jnp.float32)

    h = jnp.maximum(c(x) @ c(w1) + b1, 0.0)
    h = jnp.maximum(c(h) @ c(w2) + b2, 0.0)
    h = jnp.maximum(c(h) @ c(w3) + b3, 0.0)
    logits = c(h) @ c(w4) + b4
    return jax.nn.log_softmax(logits, axis=1)


if __name__ == "__main__":
    # Small shapes consistent with the module's structure (feature dims scaled
    # down); IN/OUT deliberately not multiples of the tiles so the padding /
    # ragged-last-tile paths used at real scale are exercised.
    B, IN_DIM, HIDDEN, OUT_DIM = 8, 4000, 128, 1200

    key = jax.random.PRNGKey(0)
    kx, kp = jax.random.split(key)
    x = jax.random.normal(kx, (B, IN_DIM), jnp.float32)
    params = init_params(kp, IN_DIM, HIDDEN, OUT_DIM)

    # 1) f32 streaming, small tiles: exercises the split reduction (2-way),
    #    the padded OUT tiles and the ragged last output tile (edge-masked,
    #    no trailing slice copy).
    out_f32 = network_forward(x, params, tk=2048, tn=512,
                              weight_dtype=jnp.float32, num_splits=2)
    out_f32 = jax.block_until_ready(out_f32)
    ref_f32 = reference_forward(x, params)
    assert out_f32.shape == (B, OUT_DIM)
    assert jnp.allclose(out_f32, ref_f32, atol=5e-4, rtol=5e-4)

    # 2) Default path: bf16 streaming, auto per-generation tiles (collapse to
    #    full dims at this scale) -> exercises the in-place aliased normalize.
    out_bf16 = network_forward(x, params)
    out_bf16 = jax.block_until_ready(out_bf16)
    ref_bf16 = reference_forward(x, params, weight_dtype=jnp.bfloat16)
    assert out_bf16.shape == (B, OUT_DIM)
    assert jnp.allclose(out_bf16, ref_bf16, atol=3e-2, rtol=3e-2)

    # 3) bf16 streaming + bf16 logits intermediate (halves the logits
    #    round-trip HBM traffic between Kernels B and C at real scale).
    out_bf16l = network_forward(x, params, tk=2048, tn=512,
                                logits_dtype=jnp.bfloat16)
    out_bf16l = jax.block_until_ready(out_bf16l)
    assert out_bf16l.shape == (B, OUT_DIM)
    assert jnp.allclose(out_bf16l, ref_bf16, atol=5e-2, rtol=5e-2)

    print("KERNEL_OK")
</pallas_src>

<mosaic_0001>
module attributes {stable_mosaic.version = 11 : i64} {
  func.func @_partial_hidden_kernel(%arg0: i32, %arg1: i32, %arg2: memref<8x2048xf32, #tpu.memory_space<vmem>>, %arg3: memref<2048x128xf32, #tpu.memory_space<vmem>>, %arg4: memref<1x8x128xf32, #tpu.memory_space<vmem>>) attributes {dimension_semantics = [#tpu.dimension_semantics<parallel>, #tpu.dimension_semantics<arbitrary>], iteration_bounds = array<i64: 2, 1>, scalar_prefetch = 0 : i64, scratch_operands = 0 : i64, tpu.core_type = #tpu.core_type<tc>, window_params = [{transform_indices = @transform_0, window_bounds = array<i64: 8, 2048>}, {transform_indices = @transform_1, window_bounds = array<i64: 2048, 128>}, {transform_indices = @transform_2, window_bounds = array<i64: 1, 8, 128>}]} {
    %c0_i32 = arith.constant 0 : i32
    %0 = arith.cmpi eq, %arg1, %c0_i32 : i32
    %1 = arith.extui %0 : i1 to i32
    %c0_i32_0 = arith.constant 0 : i32
    %2 = arith.cmpi ne, %1, %c0_i32_0 : i32
    scf.if %2 {
      %cst_10 = arith.constant 0.000000e+00 : f32
      %10 = vector.broadcast %cst_10 : f32 to vector<1x8x128xf32>
      %c0_11 = arith.constant 0 : index
      %c0_12 = arith.constant 0 : index
      %c0_13 = arith.constant 0 : index
      %11 = vector.load %arg4[%c0_11, %c0_12, %c0_13] : memref<1x8x128xf32, #tpu.memory_space<vmem>>, vector<1x8x128xf32>
      tpu.vector_store %arg4[%c0_11, %c0_12, %c0_13], %10 {strides = array<i32>} : memref<1x8x128xf32, #tpu.memory_space<vmem>>, vector<1x8x128xf32>,
    } else {
    }
    %c0 = arith.constant 0 : index
    %c0_1 = arith.constant 0 : index
    %c0_2 = arith.constant 0 : index
    %3 = vector.load %arg4[%c0, %c0_1, %c0_2] : memref<1x8x128xf32, #tpu.memory_space<vmem>>, vector<1x8x128xf32>
    %c0_3 = arith.constant 0 : index
    %c0_4 = arith.constant 0 : index
    %4 = vector.load %arg2[%c0_3, %c0_4] : memref<8x2048xf32, #tpu.memory_space<vmem>>, vector<8x2048xf32>
    %c0_5 = arith.constant 0 : index
    %c0_6 = arith.constant 0 : index
    %5 = vector.load %arg3[%c0_5, %c0_6] : memref<2048x128xf32, #tpu.memory_space<vmem>>, vector<2048x128xf32>
    %cst = arith.constant dense<0.000000e+00> : vector<8x128xf32>
    %6 = tpu.matmul %4, %5, %cst {dimension_numbers = #tpu.dot_dimension_numbers<[1], [0], [0], [1], [0, 0, 1, 1], [], []>} : vector<8x2048xf32>, vector<2048x128xf32>, vector<8x128xf32> -> vector<8x128xf32>
    %7 = vector.shape_cast %6 : vector<8x128xf32> to vector<1x8x128xf32>
    %8 = arith.addf %3, %7 : vector<1x8x128xf32>
    %c0_7 = arith.constant 0 : index
    %c0_8 = arith.constant 0 : index
    %c0_9 = arith.constant 0 : index
    %9 = vector.load %arg4[%c0_7, %c0_8, %c0_9] : memref<1x8x128xf32, #tpu.memory_space<vmem>>, vector<1x8x128xf32>
    tpu.vector_store %arg4[%c0_7, %c0_8, %c0_9], %8 {strides = array<i32>} : memref<1x8x128xf32, #tpu.memory_space<vmem>>, vector<1x8x128xf32>,
    return
  }
  func.func @transform_0(%arg0: i32, %arg1: i32) -> (i32, i32) {
    %c1_i32 = arith.constant 1 : i32
    %0 = arith.muli %arg0, %c1_i32 : i32
    %1 = arith.addi %0, %arg1 : i32
    %c0_i32 = arith.constant 0 : i32
    %c0_i32_0 = arith.constant 0 : i32
    return %c0_i32, %1 : i32, i32
  }
  func.func @transform_1(%arg0: i32, %arg1: i32) -> (i32, i32) {
    %c1_i32 = arith.constant 1 : i32
    %0 = arith.muli %arg0, %c1_i32 : i32
    %1 = arith.addi %0, %arg1 : i32
    %c0_i32 = arith.constant 0 : i32
    %c0_i32_0 = arith.constant 0 : i32
    return %1, %c0_i32 : i32, i32
  }
  func.func @transform_2(%arg0: i32, %arg1: i32) -> (i32, i32, i32) {
    %c0_i32 = arith.constant 0 : i32
    %c0_i32_0 = arith.constant 0 : i32
    %c0_i32_1 = arith.constant 0 : i32
    return %arg0, %c0_i32, %c0_i32_0 : i32, i32, i32
  }
}

</mosaic_0001>

<bundles_post_ra>
// kernel: tpu_custom_call.1
= control target key start
LH: loop header
LB: loop body
LE: loop exit
PB: predicated region body
PF: predicated region fallthrough
CT: control target
= control target key end

     0   :  { %7 = vsyncpa [#allocation3], 0  ;;  %s2152_s0 = inlined_call_operand.hbm [shape: f32[8,4096], index: 0, kind: input, shape index: {}]   ;;  %s2153_s1 = inlined_call_operand.hbm [shape: f32[4096,128], index: 1, kind: input, shape index: {}]   ;;  %s2154_s2 = inlined_call_operand.hbm [shape: f32[2,8,128], index: 2, kind: output, shape index: {}]  }
   0x1   :  { %9 = vsyncpa [#allocation3 + $0x1], 0 }
   0x2   :  { %10 = vsyncpa [#allocation6], 0 }
   0x3   :  { %12 = vsyncpa [#allocation6 + $0x1], 0 }
   0x4   :  { %13 = vsyncpa [#allocation4], 0 }
   0x5   :  { %15 = vsyncpa [#allocation4 + $0x1], 0  ;;  %s1711_s9 = smov 0   ;;  %s1713_s10 = smov 0  }
   0x6   :  { %s1715_s11 = smov 0   ;;  %s1717_s12 = smov 0  }
   0x7   :  { %s1719_s13 = smov 0   ;;  %s1721_s14 = smov 0  }
   0x8 LB: > { %s1179_s15 = sadd.s32 4294967295, %s1689_s14   ;;  %s1180_s16 = sadd.s32 4294967294, %s1689_s14   ;;  %s1689_s14 = sphi %s1721_s14, %s21_s14   ;;  %s1685_s13 = sphi %s1719_s13, %s2166_s13   ;;  %s1681_s12 = sphi %s1717_s12, %s2165_s12   ;;  %s1677_s11 = sphi %s1715_s11, %s2164_s11   ;;  %s1673_s10 = sphi %s1713_s10, %s2163_s10   ;;  %s1669_s9 = sphi %s1711_s9, %s2162_s9  }
   0x9   : > { %s33_s17 = sadd.s32 1, %s1685_s13  ;;  %s42_s18 = sadd.s32 1, %s1677_s11 }
   0xa   : > { %p35_p0 = scmp.ge.s32.totalorder %s33_s17, 2  ;;  %p49_p1 = scmp.ne.s32.totalorder %s1677_s11, %s1673_s10 }
   0xb   : > { %p50_p2 = scmp.eq.s32.totalorder %s1689_s14, 0  ;;  %p55_p3 = scmp.ne.s32.totalorder %s1673_s10, %s1669_s9 }
   0xc   : > { %s2168_s17 = smov (%p35_p0, %s33_s17), 0  ;;  %p56_p5 = scmp.eq.s32.totalorder %s1179_s15, 0 }
   0xd   : > { %p1752_p4 = por %p50_p2, %p49_p1  ;;  %s39_s20 = ssub.s32 %s1685_s13, %s2168_s17 }
   0xe   : > { %p107_p6 = scmp.eq.s32.totalorder %s1179_s15, 1  ;;  %p40_p7 = scmp.eq.s32.totalorder %s39_s20, 0 }
   0xf   : > { %p1758_p8 = por %p56_p5, %p55_p3  ;;  %p113_p10 = scmp.eq.s32.totalorder %s1180_s16, 1 }
  0x10   : > { %p1762_p9 = por %p107_p6, %p49_p1  ;;  %p1496_p13 = scmp.lt.s32.totalorder %s1689_s14, 2 }
  0x11   : > { %s1767_s23 = scalar_select %p40_p7, %s1677_s11, %s42_s18  }
  0x12   : > { %p1769_p11 = por %p113_p10, %p55_p3  ;;  %s1776_s25 = sand.u32 1, %s1677_s11  }
  0x13   : > { %s1183_s26 = sshll.u32 %s1776_s25, 7  ;;  %s1197_s27 = sshll.u32 %s1685_s13, 11 }
  0x14   : > { %s144_s30 = scalar_lea.hbm %s2152_s0, %s1197_s27  ;;  %s137_s3 = scalar_lea.vmem [#allocation2], %s1183_s26 }
  0x15   : > { %s146_s4 = sshll.u32 %s137_s3, 4  ;;  %p1785_p0 = pnand %p1496_p13, %p1752_p4  ;;  %s147_s4 = int_to_ptr.vmem [resolvable:$true] %s146_s4 }
  0x16   : > { %p1189_p1 = scmp.ge.s32.totalorder %s1689_s14, 1  ;;  %p173_p2 = scmp.lt.s32.totalorder %s1689_s14, 3 }
  0x17   : > { %s134_s6 = scalar_lea.sflag [#allocation3], %s1776_s25  ;;  %p1551_p3 = pneg %p1785_p0 }
  0x18   : > { %s1562_s7 = scalar_lea.vmem %s147_s4, 2048  ;;  %s1691_s8 = smov [#allocation2]  }
  0x19   : > { %p1563_p5 = scmp.ne.s32.totalorder %s147_s4, %s1562_s7  ;;  %s1567_s15 = sshll.u32 %s1691_s8, 4  ;;  %s1568_s15 = int_to_ptr.vmem [resolvable:$false] %s1567_s15 }
  0x1a   : > { %s1569_s16 = scalar_lea.vmem %s1568_s15, 4096  ;;  %p1570_p4 = scmp.lt.s32.totalorder %s147_s4, %s1568_s15 }
  0x1b   : > { %p1565_p6 = pnand %p1563_p5, %p1551_p3  ;;  %p1571_p10 = scmp.lt.s32.totalorder %s1569_s16, %s1562_s7 }
  0x1d   : > { %p1566_p7 = pneg %p1565_p6  ;;  %p1572_p13 = por %p1571_p10, %p1570_p4 }
  0x1f   : > { %p1573_p12 = pnand %p1572_p13, %p1566_p7 }
  0x21   : > { %1576 = shalt.err (!%p1573_p12)
}
  0x22   : > { %1488 = dma.hbm_to_vmem [thread:$0]  (!%p1785_p0), %s144_s30, 2048, %s147_s4, %s134_s6  }
  0x23   : > { %p1803_p5 = pnand %p1189_p1, %p173_p2  ;;  %s1186_s19 = sshll.u32 %s1776_s25, 11 }
  0x24   : > { %s1198_s20 = sshll.u32 %s1685_s13, 15  ;;  %s157_s29 = scalar_lea.vmem [#allocation5], %s1186_s19 }
  0x25   : > { %s164_s28 = scalar_lea.hbm %s2153_s1, %s1198_s20  ;;  %s165_s3 = sshll.u32 %s157_s29, 4  ;;  %s166_s3 = int_to_ptr.vmem [resolvable:$true] %s165_s3 }
  0x26   : > { %s154_s7 = scalar_lea.sflag [#allocation6], %s1776_s25  ;;  %s1590_s8 = scalar_lea.vmem %s166_s3, 32768 }
  0x27   : > { %p1591_p12 = scmp.ne.s32.totalorder %s166_s3, %s1590_s8  ;;  %s1692_s30 = smov [#allocation5]  }
  0x28   : > { %s1595_s4 = sshll.u32 %s1692_s30, 4  ;;  %s1596_s4 = int_to_ptr.vmem [resolvable:$false] %s1595_s4 }
  0x29   : > { %p1593_p6 = pnand %p1591_p12, %p1551_p3  ;;  %s1597_s6 = scalar_lea.vmem %s1596_s4, 65536 }
  0x2a   : > { %p1598_p1 = scmp.lt.s32.totalorder %s166_s3, %s1596_s4  ;;  %p1599_p2 = scmp.lt.s32.totalorder %s1597_s6, %s1590_s8 }
  0x2b   : > { %p1594_p7 = pneg %p1593_p6 }
  0x2c   : > { %p1600_p4 = por %p1599_p2, %p1598_p1 }
  0x2e   : > { %p1601_p10 = pnand %p1600_p4, %p1594_p7 }
  0x30   : > { %1604 = shalt.err (!%p1601_p10)
}
  0x31   : > { %s1693_s15 = smov 128   ;;  %s1694_s16 = smov 8  }
  0x32   : > { %1491 = dma.hbm_to_vmem [thread:$0]  (!%p1785_p0), %s164_s28, 32768, %s166_s3, %s154_s7, %s1693_s15, %s1693_s15, %s1694_s16  }
  0x33   : > { %177 = sbr.rel (%p1803_p5) target bundleno = 411 (0x19b), region = 28  ;;  %s1821_s25 = sand.u32 (!%p1803_p5), 1, %s1673_s10  }
  0x34   : > { %s1190_s19 = sshll.u32 (!%p1803_p5), %s1821_s25, 7  ;;  %s180_s20 = scalar_lea.sflag (!%p1803_p5), [#allocation3], %s1821_s25 }
  0x35   : > { %s1825_s26 = scalar_lea.vmem (!%p1803_p5), [#allocation2], %s1190_s19 }
  0x38   : > { %1656 = dma.done.wait (%p1758_p8), %s180_s20, 2048  }
  0x39   : > { %1658 = vsyncadd (%p1758_p8), %s180_s20, 4294965248  ;;  %s1191_s5 = sshll.u32 %s1821_s25, 11  ;;  %s189_s18 = scalar_lea.sflag [#allocation6], %s1821_s25 }
  0x3a   : > { %s1833_s27 = scalar_lea.vmem [#allocation5], %s1191_s5 }
  0x3b   : > { %1660 = dma.done.wait (%p1758_p8), %s189_s18, 32768  }
  0x3c   : > { %1662 = vsyncadd (%p1758_p8), %s189_s18, 4294934528  ;;  %v275_v0 = vld [vmem:[%s1833_s27 + $0xf8] sm:$0xff]  ;;  %v274_v4 = vld [vmem:[%s1833_s27 + $0xf0] sm:$0xff]  ;;  %s1192_s21 = sshll.u32 %s1821_s25, 3  ;;  %s1194_s28 = sshll.u32 %s1681_s12, 7 }
  0x3d   : > { %v307_v1 = vld [vmem:[%s1833_s27 + $0x1f8] sm:$0xff]  ;;  %1199 = vmatprep.subr.mxu0 %v275_v0  ;;  %v306_v5 = vld [vmem:[%s1833_s27 + $0x1f0] sm:$0xff]  ;;  %v273_v8 = vld [vmem:[%s1833_s27 + $0xe8] sm:$0xff]  ;;  %s217_s29 = scalar_lea.vmem [#allocation7], %s1192_s21  ;;  %s1074_s30 = scalar_lea.hbm %s2154_s2, %s1194_s28 }
  0x3e   : > { %v259_v2 = vld [vmem:[%s1833_s27 + $0x78] sm:$0xff]  ;;  %1234 = vmatprep.subr.mxu1 %v307_v1  ;;  %v258_v6 = vld [vmem:[%s1833_s27 + $0x70] sm:$0xff]  ;;  %v305_v9 = vld [vmem:[%s1833_s27 + $0x1e8] sm:$0xff]  ;;  %s1076_s3 = sshll.u32 %s217_s29, 4  ;;  %s1063_s4 = scalar_lea.sflag [#allocation4], %s1821_s25  ;;  %s1077_s3 = int_to_ptr.vmem [resolvable:$true] %s1076_s3 }
  0x3f   : > { %v291_v3 = vld [vmem:[%s1833_s27 + $0x178] sm:$0xff]  ;;  %1200 = vmatpush3.msra.mxu0 %v259_v2  ;;  %v290_v7 = vld [vmem:[%s1833_s27 + $0x170] sm:$0xff]  ;;  %v257_v10 = vld [vmem:[%s1833_s27 + $0x68] sm:$0xff]  ;;  %s1605_s6 = scalar_lea.vmem %s1077_s3, 128  ;;  %s1695_s15 = smov [#allocation7]  }
  0x40   : > { %1235 = vmatpush3.msra.mxu1 %v291_v3  ;;  %1201 = vmatprep.subr.mxu0 %v274_v4  ;;  %v289_v11 = vld [vmem:[%s1833_s27 + $0x168] sm:$0xff]  ;;  %v272_v12 = vld [vmem:[%s1833_s27 + $0xe0] sm:$0xff]  ;;  %v271_v16 = vld [vmem:[%s1833_s27 + $0xd8] sm:$0xff]  ;;  %p1606_p8 = scmp.ne.s32.totalorder %s1077_s3, %s1605_s6  ;;  %s1609_s16 = sshll.u32 %s1695_s15, 4  ;;  %s1610_s16 = int_to_ptr.vmem [resolvable:$false] %s1609_s16 }
  0x41   : > { %1236 = vmatprep.subr.mxu1 %v306_v5  ;;  %1202 = vmatpush3.msra.mxu0 %v258_v6  ;;  %v304_v13 = vld [vmem:[%s1833_s27 + $0x1e0] sm:$0xff]  ;;  %v303_v17 = vld [vmem:[%s1833_s27 + $0x1d8] sm:$0xff]  ;;  %v270_v20 = vld [vmem:[%s1833_s27 + $0xd0] sm:$0xff]  ;;  %s1611_s19 = scalar_lea.vmem %s1610_s16, 256  ;;  %p1612_p13 = scmp.lt.s32.totalorder %s1077_s3, %s1610_s16 }
  0x42   : > { %1237 = vmatpush3.msra.mxu1 %v290_v7  ;;  %1203 = vmatprep.subr.mxu0 %v273_v8  ;;  %v256_v14 = vld [vmem:[%s1833_s27 + $0x60] sm:$0xff]  ;;  %v255_v18 = vld [vmem:[%s1833_s27 + $0x58] sm:$0xff]  ;;  %v302_v21 = vld [vmem:[%s1833_s27 + $0x1d0] sm:$0xff]  ;;  %p1607_p0 = pnand %p1606_p8, %p1762_p9  ;;  %p1613_p5 = scmp.lt.s32.totalorder %s1611_s19, %s1605_s6 }
  0x43   : > { %1238 = vmatprep.subr.mxu1 %v305_v9  ;;  %v288_v15 = vld [vmem:[%s1833_s27 + $0x160] sm:$0xff]  ;;  %1204 = vmatpush3.msra.mxu0 %v257_v10  ;;  %v287_v19 = vld [vmem:[%s1833_s27 + $0x158] sm:$0xff]  ;;  %v254_v22 = vld [vmem:[%s1833_s27 + $0x50] sm:$0xff] }
  0x44   : > { %1239 = vmatpush3.msra.mxu1 %v289_v11  ;;  %1205 = vmatprep.subr.mxu0 %v272_v12  ;;  %v286_v23 = vld [vmem:[%s1833_s27 + $0x150] sm:$0xff]  ;;  %v269_v24 = vld [vmem:[%s1833_s27 + $0xc8] sm:$0xff]  ;;  %v268_v28 = vld [vmem:[%s1833_s27 + $0xc0] sm:$0xff]  ;;  %p1608_p3 = pneg %p1607_p0  ;;  %p1614_p12 = por %p1613_p5, %p1612_p13 }
  0x45   : > { %1240 = vmatprep.subr.mxu1 %v304_v13  ;;  %1206 = vmatpush3.msra.mxu0 %v256_v14  ;;  %v301_v25 = vld [vmem:[%s1833_s27 + $0x1c8] sm:$0xff]  ;;  %v300_v29 = vld [vmem:[%s1833_s27 + $0x1c0] sm:$0xff]  ;;  %v267_v32 = vld [vmem:[%s1833_s27 + $0xb8] sm:$0xff] }
  0x46   : > { %1241 = vmatpush3.msra.mxu1 %v288_v15  ;;  %1207 = vmatprep.subr.mxu0 %v271_v16  ;;  %v253_v26 = vld [vmem:[%s1833_s27 + $0x48] sm:$0xff]  ;;  %v252_v30 = vld [vmem:[%s1833_s27 + $0x40] sm:$0xff]  ;;  %v299_v33 = vld [vmem:[%s1833_s27 + $0x1b8] sm:$0xff]  ;;  %p1615_p6 = pnand %p1614_p12, %p1608_p3 }
  0x47   : > { %1242 = vmatprep.subr.mxu1 %v303_v17  ;;  %1208 = vmatpush3.msra.mxu0 %v255_v18  ;;  %v285_v27 = vld [vmem:[%s1833_s27 + $0x148] sm:$0xff]  ;;  %v284_v31 = vld [vmem:[%s1833_s27 + $0x140] sm:$0xff]  ;;  %v251_v34 = vld [vmem:[%s1833_s27 + $0x38] sm:$0xff] }
  0x48   : > { %1243 = vmatpush3.msra.mxu1 %v287_v19  ;;  %1209 = vmatprep.subr.mxu0 %v270_v20  ;;  %v283_v35 = vld [vmem:[%s1833_s27 + $0x138] sm:$0xff]  ;;  %v266_v36 = vld [vmem:[%s1833_s27 + $0xb0] sm:$0xff]  ;;  %v265_v40 = vld [vmem:[%s1833_s27 + $0xa8] sm:$0xff] }
  0x49   : > { %1244 = vmatprep.subr.mxu1 %v302_v21  ;;  %1210 = vmatpush3.msra.mxu0 %v254_v22  ;;  %v298_v37 = vld [vmem:[%s1833_s27 + $0x1b0] sm:$0xff]  ;;  %v297_v41 = vld [vmem:[%s1833_s27 + $0x1a8] sm:$0xff]  ;;  %v264_v44 = vld [vmem:[%s1833_s27 + $0xa0] sm:$0xff] }
  0x4a   : > { %1245 = vmatpush3.msra.mxu1 %v286_v23  ;;  %1211 = vmatprep.subr.mxu0 %v269_v24  ;;  %v250_v38 = vld [vmem:[%s1833_s27 + $0x30] sm:$0xff]  ;;  %v249_v42 = vld [vmem:[%s1833_s27 + $0x28] sm:$0xff]  ;;  %v296_v45 = vld [vmem:[%s1833_s27 + $0x1a0] sm:$0xff] }
  0x4b   : > { %1246 = vmatprep.subr.mxu1 %v301_v25  ;;  %1212 = vmatpush3.msra.mxu0 %v253_v26  ;;  %v282_v39 = vld [vmem:[%s1833_s27 + $0x130] sm:$0xff]  ;;  %v281_v43 = vld [vmem:[%s1833_s27 + $0x128] sm:$0xff]  ;;  %v248_v46 = vld [vmem:[%s1833_s27 + $0x20] sm:$0xff] }
  0x4c   : > { %1247 = vmatpush3.msra.mxu1 %v285_v27  ;;  %1213 = vmatprep.subr.mxu0 %v268_v28  ;;  %v280_v47 = vld [vmem:[%s1833_s27 + $0x120] sm:$0xff]  ;;  %v263_v48 = vld [vmem:[%s1833_s27 + $0x98] sm:$0xff]  ;;  %v262_v52 = vld [vmem:[%s1833_s27 + $0x90] sm:$0xff] }
  0x4d   : > { %1248 = vmatprep.subr.mxu1 %v300_v29  ;;  %1214 = vmatpush3.msra.mxu0 %v252_v30  ;;  %v295_v49 = vld [vmem:[%s1833_s27 + $0x198] sm:$0xff]  ;;  %v294_v53 = vld [vmem:[%s1833_s27 + $0x190] sm:$0xff]  ;;  %v261_v56 = vld [vmem:[%s1833_s27 + $0x88] sm:$0xff] }
  0x4e   : > { %1249 = vmatpush3.msra.mxu1 %v284_v31  ;;  %1215 = vmatprep.subr.mxu0 %v267_v32  ;;  %v247_v50 = vld [vmem:[%s1833_s27 + $0x18] sm:$0xff]  ;;  %v246_v54 = vld [vmem:[%s1833_s27 + $0x10] sm:$0xff]  ;;  %v293_v57 = vld [vmem:[%s1833_s27 + $0x188] sm:$0xff] }
  0x4f   : > { %1250 = vmatprep.subr.mxu1 %v299_v33  ;;  %1216 = vmatpush3.msra.mxu0 %v251_v34  ;;  %v279_v51 = vld [vmem:[%s1833_s27 + $0x118] sm:$0xff]  ;;  %v278_v55 = vld [vmem:[%s1833_s27 + $0x110] sm:$0xff]  ;;  %v245_v58 = vld [vmem:[%s1833_s27 + $0x8] sm:$0xff] }
  0x50   : > { %1251 = vmatpush3.msra.mxu1 %v283_v35  ;;  %1217 = vmatprep.subr.mxu0 %v266_v36  ;;  %v277_v59 = vld [vmem:[%s1833_s27 + $0x108] sm:$0xff]  ;;  %v260_v60 = vld [vmem:[%s1833_s27 + $0x80] sm:$0xff]  ;;  %v231_v1 = vld [vmem:[%s1825_s26 + $0x18] sm:$0xff] }
  0x51   : > { %1252 = vmatprep.subr.mxu1 %v298_v37  ;;  %1218 = vmatpush3.msra.mxu0 %v250_v38  ;;  %v292_v61 = vld [vmem:[%s1833_s27 + $0x180] sm:$0xff]  ;;  %v229_v63 = vld [vmem:[%s1825_s26 + $0x8] sm:$0xff]  ;;  %v230_v3 = vld [vmem:[%s1825_s26 + $0x10] sm:$0xff] }
  0x52   : > { %1253 = vmatpush3.msra.mxu1 %v282_v39  ;;  %1219 = vmatprep.subr.mxu0 %v265_v40  ;;  %v244_v62 = vld [vmem:[%s1833_s27] sm:$0xff]  ;;  %v339_v4 = vld [vmem:[%s1833_s27 + $0x2f8] sm:$0xff]  ;;  %v338_v8 = vld [vmem:[%s1833_s27 + $0x2f0] sm:$0xff] }
  0x53   : > { %1254 = vmatprep.subr.mxu1 %v297_v41  ;;  %1220 = vmatpush3.msra.mxu0 %v249_v42  ;;  %v276_v0 = vld [vmem:[%s1833_s27 + $0x100] sm:$0xff]  ;;  %v371_v5 = vld [vmem:[%s1833_s27 + $0x3f8] sm:$0xff]  ;;  %v370_v9 = vld [vmem:[%s1833_s27 + $0x3f0] sm:$0xff] }
  0x54   : > { %1255 = vmatpush3.msra.mxu1 %v281_v43  ;;  %1221 = vmatprep.subr.mxu0 %v264_v44  ;;  %v228_v2 = vld [vmem:[%s1825_s26] sm:$0xff]  ;;  %v323_v6 = vld [vmem:[%s1833_s27 + $0x278] sm:$0xff]  ;;  %v322_v10 = vld [vmem:[%s1833_s27 + $0x270] sm:$0xff] }
  0x55   : > { %1256 = vmatprep.subr.mxu1 %v296_v45  ;;  %1222 = vmatpush3.msra.mxu0 %v248_v46  ;;  %v355_v7 = vld [vmem:[%s1833_s27 + $0x378] sm:$0xff]  ;;  %v354_v11 = vld [vmem:[%s1833_s27 + $0x370] sm:$0xff]  ;;  %v337_v12 = vld [vmem:[%s1833_s27 + $0x2e8] sm:$0xff] }
  0x56   : > { %1257 = vmatpush3.msra.mxu1 %v280_v47  ;;  %1223 = vmatprep.subr.mxu0 %v263_v48  ;;  %v369_v13 = vld [vmem:[%s1833_s27 + $0x3e8] sm:$0xff]  ;;  %v336_v16 = vld [vmem:[%s1833_s27 + $0x2e0] sm:$0xff]  ;;  %v335_v20 = vld [vmem:[%s1833_s27 + $0x2d8] sm:$0xff] }
  0x57   : > { %1258 = vmatprep.subr.mxu1 %v295_v49  ;;  %1224 = vmatpush3.msra.mxu0 %v247_v50  ;;  %v321_v14 = vld [vmem:[%s1833_s27 + $0x268] sm:$0xff]  ;;  %v368_v17 = vld [vmem:[%s1833_s27 + $0x3e0] sm:$0xff]  ;;  %v367_v21 = vld [vmem:[%s1833_s27 + $0x3d8] sm:$0xff] }
  0x58   : > { %1259 = vmatpush3.msra.mxu1 %v279_v51  ;;  %1225 = vmatprep.subr.mxu0 %v262_v52  ;;  %v353_v15 = vld [vmem:[%s1833_s27 + $0x368] sm:$0xff]  ;;  %v320_v18 = vld [vmem:[%s1833_s27 + $0x260] sm:$0xff]  ;;  %v319_v22 = vld [vmem:[%s1833_s27 + $0x258] sm:$0xff] }
  0x59   : > { %1260 = vmatprep.subr.mxu1 %v294_v53  ;;  %1226 = vmatpush3.msra.mxu0 %v246_v54  ;;  %v352_v19 = vld [vmem:[%s1833_s27 + $0x360] sm:$0xff]  ;;  %v351_v23 = vld [vmem:[%s1833_s27 + $0x358] sm:$0xff]  ;;  %v334_v24 = vld [vmem:[%s1833_s27 + $0x2d0] sm:$0xff] }
  0x5a   : > { %1261 = vmatpush3.msra.mxu1 %v278_v55  ;;  %1227 = vmatprep.subr.mxu0 %v261_v56  ;;  %v366_v25 = vld [vmem:[%s1833_s27 + $0x3d0] sm:$0xff]  ;;  %v333_v28 = vld [vmem:[%s1833_s27 + $0x2c8] sm:$0xff]  ;;  %v332_v32 = vld [vmem:[%s1833_s27 + $0x2c0] sm:$0xff] }
  0x5b   : > { %1262 = vmatprep.subr.mxu1 %v293_v57  ;;  %1228 = vmatpush3.msra.mxu0 %v245_v58  ;;  %v318_v26 = vld [vmem:[%s1833_s27 + $0x250] sm:$0xff]  ;;  %v365_v29 = vld [vmem:[%s1833_s27 + $0x3c8] sm:$0xff]  ;;  %v364_v33 = vld [vmem:[%s1833_s27 + $0x3c0] sm:$0xff] }
  0x5c   : > { %1263 = vmatpush3.msra.mxu1 %v277_v59  ;;  %1229 = vmatprep.subr.mxu0 %v260_v60  ;;  %v350_v27 = vld [vmem:[%s1833_s27 + $0x350] sm:$0xff]  ;;  %v317_v30 = vld [vmem:[%s1833_s27 + $0x248] sm:$0xff]  ;;  %v316_v34 = vld [vmem:[%s1833_s27 + $0x240] sm:$0xff] }
  0x5d   : > { %1264 = vmatprep.subr.mxu1 %v292_v61  ;;  %1230 = vmatpush3.msra.mxu0 %v244_v62  ;;  %v349_v31 = vld [vmem:[%s1833_s27 + $0x348] sm:$0xff]  ;;  %v348_v35 = vld [vmem:[%s1833_s27 + $0x340] sm:$0xff]  ;;  %v331_v36 = vld [vmem:[%s1833_s27 + $0x2b8] sm:$0xff] }
  0x5e   : > { %564 = vmatprep.mubr.f32.mxu0 %v229_v63  ;;  %1265 = vmatpush3.msra.mxu1 %v276_v0  ;;  %v363_v37 = vld [vmem:[%s1833_s27 + $0x3b8] sm:$0xff]  ;;  %v330_v40 = vld [vmem:[%s1833_s27 + $0x2b0] sm:$0xff]  ;;  %v329_v44 = vld [vmem:[%s1833_s27 + $0x2a8] sm:$0xff] }
  0x5f   : > { %634 = vmatprep.mubr.f32.mxu1 %v231_v1  ;;  %565 = vmatmul.mubr.f32.vlgmr.msra.gmra.mxu0 %v228_v2  ;;  %v315_v38 = vld [vmem:[%s1833_s27 + $0x238] sm:$0xff]  ;;  %v362_v41 = vld [vmem:[%s1833_s27 + $0x3b0] sm:$0xff]  ;;  %v361_v45 = vld [vmem:[%s1833_s27 + $0x3a8] sm:$0xff] }
  0x60   : > { %635 = vmatmul.mubr.f32.vlgmr.msra.gmra.mxu1 %v230_v3  ;;  %1269 = vmatprep.subr.mxu0 %v339_v4  ;;  %v347_v39 = vld [vmem:[%s1833_s27 + $0x338] sm:$0xff]  ;;  %v314_v42 = vld [vmem:[%s1833_s27 + $0x230] sm:$0xff]  ;;  %v313_v46 = vld [vmem:[%s1833_s27 + $0x228] sm:$0xff] }
  0x61   : > { %1304 = vmatprep.subr.mxu1 %v371_v5  ;;  %1270 = vmatpush3.msra.mxu0 %v323_v6  ;;  %v346_v43 = vld [vmem:[%s1833_s27 + $0x330] sm:$0xff]  ;;  %v345_v47 = vld [vmem:[%s1833_s27 + $0x328] sm:$0xff]  ;;  %v328_v48 = vld [vmem:[%s1833_s27 + $0x2a0] sm:$0xff] }
  0x62   : > { %1305 = vmatpush3.msra.mxu1 %v355_v7  ;;  %1271 = vmatprep.subr.mxu0 %v338_v8  ;;  %v360_v49 = vld [vmem:[%s1833_s27 + $0x3a0] sm:$0xff]  ;;  %v327_v52 = vld [vmem:[%s1833_s27 + $0x298] sm:$0xff]  ;;  %v326_v56 = vld [vmem:[%s1833_s27 + $0x290] sm:$0xff] }
  0x63   : > { %1306 = vmatprep.subr.mxu1 %v370_v9  ;;  %1272 = vmatpush3.msra.mxu0 %v322_v10  ;;  %v312_v50 = vld [vmem:[%s1833_s27 + $0x220] sm:$0xff]  ;;  %v359_v53 = vld [vmem:[%s1833_s27 + $0x398] sm:$0xff]  ;;  %v358_v57 = vld [vmem:[%s1833_s27 + $0x390] sm:$0xff] }
  0x64   : > { %1307 = vmatpush3.msra.mxu1 %v354_v11  ;;  %1273 = vmatprep.subr.mxu0 %v337_v12  ;;  %v344_v51 = vld [vmem:[%s1833_s27 + $0x320] sm:$0xff]  ;;  %v311_v54 = vld [vmem:[%s1833_s27 + $0x218] sm:$0xff]  ;;  %v310_v58 = vld [vmem:[%s1833_s27 + $0x210] sm:$0xff] }
  0x65   : > { %1308 = vmatprep.subr.mxu1 %v369_v13  ;;  %1274 = vmatpush3.msra.mxu0 %v321_v14  ;;  %v343_v55 = vld [vmem:[%s1833_s27 + $0x318] sm:$0xff]  ;;  %v342_v59 = vld [vmem:[%s1833_s27 + $0x310] sm:$0xff]  ;;  %v325_v60 = vld [vmem:[%s1833_s27 + $0x288] sm:$0xff] }
  0x66   : > { %1309 = vmatpush3.msra.mxu1 %v353_v15  ;;  %1275 = vmatprep.subr.mxu0 %v336_v16  ;;  %v357_v61 = vld [vmem:[%s1833_s27 + $0x388] sm:$0xff]  ;;  %v324_v0 = vld [vmem:[%s1833_s27 + $0x280] sm:$0xff]  ;;  %v235_v6 = vld [vmem:[%s1825_s26 + $0x38] sm:$0xff] }
  0x67   : > { %1310 = vmatprep.subr.mxu1 %v368_v17  ;;  %1276 = vmatpush3.msra.mxu0 %v320_v18  ;;  %v309_v62 = vld [vmem:[%s1833_s27 + $0x208] sm:$0xff]  ;;  %v356_v1 = vld [vmem:[%s1833_s27 + $0x380] sm:$0xff]  ;;  %v403_v7 = vld [vmem:[%s1833_s27 + $0x4f8] sm:$0xff] }
  0x68   : > { %1311 = vmatpush3.msra.mxu1 %v352_v19  ;;  %1277 = vmatprep.subr.mxu0 %v335_v20  ;;  %v341_v63 = vld [vmem:[%s1833_s27 + $0x308] sm:$0xff]  ;;  %v308_v2 = vld [vmem:[%s1833_s27 + $0x200] sm:$0xff]  ;;  %v435_v8 = vld [vmem:[%s1833_s27 + $0x5f8] sm:$0xff] }
  0x69   : > { %1312 = vmatprep.subr.mxu1 %v367_v21  ;;  %1278 = vmatpush3.msra.mxu0 %v319_v22  ;;  %v233_v3 = vld [vmem:[%s1825_s26 + $0x28] sm:$0xff]  ;;  %v340_v4 = vld [vmem:[%s1833_s27 + $0x300] sm:$0xff]  ;;  %v234_v9 = vld [vmem:[%s1825_s26 + $0x30] sm:$0xff] }
  0x6a   : > { %1313 = vmatpush3.msra.mxu1 %v351_v23  ;;  %1279 = vmatprep.subr.mxu0 %v334_v24  ;;  %v232_v5 = vld [vmem:[%s1825_s26 + $0x20] sm:$0xff]  ;;  %v387_v10 = vld [vmem:[%s1833_s27 + $0x478] sm:$0xff]  ;;  %v402_v12 = vld [vmem:[%s1833_s27 + $0x4f0] sm:$0xff] }
  0x6b   : > { %1314 = vmatprep.subr.mxu1 %v366_v25  ;;  %1280 = vmatpush3.msra.mxu0 %v318_v26  ;;  %v419_v11 = vld [vmem:[%s1833_s27 + $0x578] sm:$0xff]  ;;  %v434_v13 = vld [vmem:[%s1833_s27 + $0x5f0] sm:$0xff]  ;;  %v401_v16 = vld [vmem:[%s1833_s27 + $0x4e8] sm:$0xff] }
  0x6c   : > { %1315 = vmatpush3.msra.mxu1 %v350_v27  ;;  %1281 = vmatprep.subr.mxu0 %v333_v28  ;;  %v386_v14 = vld [vmem:[%s1833_s27 + $0x470] sm:$0xff]  ;;  %v433_v17 = vld [vmem:[%s1833_s27 + $0x5e8] sm:$0xff]  ;;  %v400_v20 = vld [vmem:[%s1833_s27 + $0x4e0] sm:$0xff] }
  0x6d   : > { %1316 = vmatprep.subr.mxu1 %v365_v29  ;;  %1282 = vmatpush3.msra.mxu0 %v317_v30  ;;  %v418_v15 = vld [vmem:[%s1833_s27 + $0x570] sm:$0xff]  ;;  %v385_v18 = vld [vmem:[%s1833_s27 + $0x468] sm:$0xff]  ;;  %v432_v21 = vld [vmem:[%s1833_s27 + $0x5e0] sm:$0xff] }
  0x6e   : > { %1317 = vmatpush3.msra.mxu1 %v349_v31  ;;  %1283 = vmatprep.subr.mxu0 %v332_v32  ;;  %v417_v19 = vld [vmem:[%s1833_s27 + $0x568] sm:$0xff]  ;;  %v384_v22 = vld [vmem:[%s1833_s27 + $0x460] sm:$0xff]  ;;  %v399_v24 = vld [vmem:[%s1833_s27 + $0x4d8] sm:$0xff] }
  0x6f   : > { %1318 = vmatprep.subr.mxu1 %v364_v33  ;;  %1284 = vmatpush3.msra.mxu0 %v316_v34  ;;  %v416_v23 = vld [vmem:[%s1833_s27 + $0x560] sm:$0xff]  ;;  %v431_v25 = vld [vmem:[%s1833_s27 + $0x5d8] sm:$0xff]  ;;  %v398_v28 = vld [vmem:[%s1833_s27 + $0x4d0] sm:$0xff] }
  0x70   : > { %1319 = vmatpush3.msra.mxu1 %v348_v35  ;;  %1285 = vmatprep.subr.mxu0 %v331_v36  ;;  %v383_v26 = vld [vmem:[%s1833_s27 + $0x458] sm:$0xff]  ;;  %v430_v29 = vld [vmem:[%s1833_s27 + $0x5d0] sm:$0xff]  ;;  %v397_v32 = vld [vmem:[%s1833_s27 + $0x4c8] sm:$0xff] }
  0x71   : > { %1320 = vmatprep.subr.mxu1 %v363_v37  ;;  %1286 = vmatpush3.msra.mxu0 %v315_v38  ;;  %v415_v27 = vld [vmem:[%s1833_s27 + $0x558] sm:$0xff]  ;;  %v382_v30 = vld [vmem:[%s1833_s27 + $0x450] sm:$0xff]  ;;  %v429_v33 = vld [vmem:[%s1833_s27 + $0x5c8] sm:$0xff] }
  0x72   : > { %1321 = vmatpush3.msra.mxu1 %v347_v39  ;;  %1287 = vmatprep.subr.mxu0 %v330_v40  ;;  %v414_v31 = vld [vmem:[%s1833_s27 + $0x550] sm:$0xff]  ;;  %v381_v34 = vld [vmem:[%s1833_s27 + $0x448] sm:$0xff]  ;;  %v396_v36 = vld [vmem:[%s1833_s27 + $0x4c0] sm:$0xff] }
  0x73   : > { %1322 = vmatprep.subr.mxu1 %v362_v41  ;;  %1288 = vmatpush3.msra.mxu0 %v314_v42  ;;  %v413_v35 = vld [vmem:[%s1833_s27 + $0x548] sm:$0xff]  ;;  %v428_v37 = vld [vmem:[%s1833_s27 + $0x5c0] sm:$0xff]  ;;  %v395_v40 = vld [vmem:[%s1833_s27 + $0x4b8] sm:$0xff] }
  0x74   : > { %1323 = vmatpush3.msra.mxu1 %v346_v43  ;;  %1289 = vmatprep.subr.mxu0 %v329_v44  ;;  %v380_v38 = vld [vmem:[%s1833_s27 + $0x440] sm:$0xff]  ;;  %v427_v41 = vld [vmem:[%s1833_s27 + $0x5b8] sm:$0xff]  ;;  %v394_v44 = vld [vmem:[%s1833_s27 + $0x4b0] sm:$0xff] }
  0x75   : > { %1324 = vmatprep.subr.mxu1 %v361_v45  ;;  %1290 = vmatpush3.msra.mxu0 %v313_v46  ;;  %v412_v39 = vld [vmem:[%s1833_s27 + $0x540] sm:$0xff]  ;;  %v379_v42 = vld [vmem:[%s1833_s27 + $0x438] sm:$0xff]  ;;  %v426_v45 = vld [vmem:[%s1833_s27 + $0x5b0] sm:$0xff] }
  0x76   : > { %1325 = vmatpush3.msra.mxu1 %v345_v47  ;;  %1291 = vmatprep.subr.mxu0 %v328_v48  ;;  %v411_v43 = vld [vmem:[%s1833_s27 + $0x538] sm:$0xff]  ;;  %v378_v46 = vld [vmem:[%s1833_s27 + $0x430] sm:$0xff]  ;;  %v393_v48 = vld [vmem:[%s1833_s27 + $0x4a8] sm:$0xff] }
  0x77   : > { %1326 = vmatprep.subr.mxu1 %v360_v49  ;;  %1292 = vmatpush3.msra.mxu0 %v312_v50  ;;  %v410_v47 = vld [vmem:[%s1833_s27 + $0x530] sm:$0xff]  ;;  %v425_v49 = vld [vmem:[%s1833_s27 + $0x5a8] sm:$0xff] }
  0x78   : > { %1327 = vmatpush3.msra.mxu1 %v344_v51  ;;  %1293 = vmatprep.subr.mxu0 %v327_v52  ;;  %v377_v50 = vld [vmem:[%s1833_s27 + $0x428] sm:$0xff]  ;;  %v392_v52 = vld [vmem:[%s1833_s27 + $0x4a0] sm:$0xff] }
  0x79   : > { %1328 = vmatprep.subr.mxu1 %v359_v53  ;;  %1294 = vmatpush3.msra.mxu0 %v311_v54  ;;  %v409_v51 = vld [vmem:[%s1833_s27 + $0x528] sm:$0xff]  ;;  %v424_v53 = vld [vmem:[%s1833_s27 + $0x5a0] sm:$0xff] }
  0x7a   : > { %1329 = vmatpush3.msra.mxu1 %v343_v55  ;;  %1295 = vmatprep.subr.mxu0 %v326_v56  ;;  %v376_v54 = vld [vmem:[%s1833_s27 + $0x420] sm:$0xff]  ;;  %v391_v56 = vld [vmem:[%s1833_s27 + $0x498] sm:$0xff] }
  0x7b   : > { %1330 = vmatprep.subr.mxu1 %v358_v57  ;;  %1296 = vmatpush3.msra.mxu0 %v310_v58  ;;  %v408_v55 = vld [vmem:[%s1833_s27 + $0x520] sm:$0xff]  ;;  %v423_v57 = vld [vmem:[%s1833_s27 + $0x598] sm:$0xff] }
  0x7c   : > { %1331 = vmatpush3.msra.mxu1 %v342_v59  ;;  %1297 = vmatprep.subr.mxu0 %v325_v60  ;;  %v375_v58 = vld [vmem:[%s1833_s27 + $0x418] sm:$0xff]  ;;  %v390_v60 = vld [vmem:[%s1833_s27 + $0x490] sm:$0xff] }
  0x7d   : > { %1332 = vmatprep.subr.mxu1 %v357_v61  ;;  %1298 = vmatpush3.msra.mxu0 %v309_v62  ;;  %v407_v59 = vld [vmem:[%s1833_s27 + $0x518] sm:$0xff]  ;;  %v422_v61 = vld [vmem:[%s1833_s27 + $0x590] sm:$0xff] }
  0x7e   : > { %1333 = vmatpush3.msra.mxu1 %v341_v63  ;;  %1299 = vmatprep.subr.mxu0 %v324_v0  ;;  %v374_v62 = vld [vmem:[%s1833_s27 + $0x410] sm:$0xff]  ;;  %v389_v0 = vld [vmem:[%s1833_s27 + $0x488] sm:$0xff] }
  0x7f   : > { %1334 = vmatprep.subr.mxu1 %v356_v1  ;;  %1300 = vmatpush3.msra.mxu0 %v308_v2  ;;  %v406_v63 = vld [vmem:[%s1833_s27 + $0x510] sm:$0xff]  ;;  %v421_v1 = vld [vmem:[%s1833_s27 + $0x588] sm:$0xff] }
  0x80   : > { %704 = vmatprep.mubr.f32.mxu0 %v233_v3  ;;  %1335 = vmatpush3.msra.mxu1 %v340_v4  ;;  %v373_v2 = vld [vmem:[%s1833_s27 + $0x408] sm:$0xff]  ;;  %v388_v4 = vld [vmem:[%s1833_s27 + $0x480] sm:$0xff] }
  0x81   : > { %705 = vmatmul.mubr.f32.vlgmr.msra.gmra.mxu0 %v232_v5  ;;  %774 = vmatprep.mubr.f32.mxu1 %v235_v6  ;;  %v405_v3 = vld [vmem:[%s1833_s27 + $0x508] sm:$0xff]  ;;  %v420_v5 = vld [vmem:[%s1833_s27 + $0x580] sm:$0xff] }
  0x82   : > { %1339 = vmatprep.subr.mxu0 %v403_v7  ;;  %1374 = vmatprep.subr.mxu1 %v435_v8  ;;  %v372_v6 = vld [vmem:[%s1833_s27 + $0x400] sm:$0xff]  ;;  %v237_v7 = vld [vmem:[%s1825_s26 + $0x48] sm:$0xff] }
  0x83   : > { %775 = vmatmul.mubr.f32.vlgmr.msra.gmra.mxu1 %v234_v9  ;;  %1340 = vmatpush3.msra.mxu0 %v387_v10  ;;  %v404_v8 = vld [vmem:[%s1833_s27 + $0x500] sm:$0xff]  ;;  %v239_v10 = vld [vmem:[%s1825_s26 + $0x58] sm:$0xff] }
  0x84   : > { %1375 = vmatpush3.msra.mxu1 %v419_v11  ;;  %1341 = vmatprep.subr.mxu0 %v402_v12  ;;  %v236_v9 = vld [vmem:[%s1825_s26 + $0x40] sm:$0xff]  ;;  %v467_v11 = vld [vmem:[%s1833_s27 + $0x6f8] sm:$0xff] }
  0x85   : > { %1376 = vmatprep.subr.mxu1 %v434_v13  ;;  %1342 = vmatpush3.msra.mxu0 %v386_v14  ;;  %v499_v12 = vld [vmem:[%s1833_s27 + $0x7f8] sm:$0xff]  ;;  %v238_v13 = vld [vmem:[%s1825_s26 + $0x50] sm:$0xff] }
  0x86   : > { %1377 = vmatpush3.msra.mxu1 %v418_v15  ;;  %1343 = vmatprep.subr.mxu0 %v401_v16  ;;  %v451_v14 = vld [vmem:[%s1833_s27 + $0x678] sm:$0xff]  ;;  %v466_v16 = vld [vmem:[%s1833_s27 + $0x6f0] sm:$0xff] }
  0x87   : > { %1378 = vmatprep.subr.mxu1 %v433_v17  ;;  %1344 = vmatpush3.msra.mxu0 %v385_v18  ;;  %v483_v15 = vld [vmem:[%s1833_s27 + $0x778] sm:$0xff]  ;;  %v498_v17 = vld [vmem:[%s1833_s27 + $0x7f0] sm:$0xff] }
  0x88   : > { %1379 = vmatpush3.msra.mxu1 %v417_v19  ;;  %1345 = vmatprep.subr.mxu0 %v400_v20  ;;  %v450_v18 = vld [vmem:[%s1833_s27 + $0x670] sm:$0xff]  ;;  %v465_v20 = vld [vmem:[%s1833_s27 + $0x6e8] sm:$0xff] }
  0x89   : > { %1380 = vmatprep.subr.mxu1 %v432_v21  ;;  %1346 = vmatpush3.msra.mxu0 %v384_v22  ;;  %v482_v19 = vld [vmem:[%s1833_s27 + $0x770] sm:$0xff]  ;;  %v497_v21 = vld [vmem:[%s1833_s27 + $0x7e8] sm:$0xff] }
  0x8a   : > { %1381 = vmatpush3.msra.mxu1 %v416_v23  ;;  %1347 = vmatprep.subr.mxu0 %v399_v24  ;;  %v449_v22 = vld [vmem:[%s1833_s27 + $0x668] sm:$0xff]  ;;  %v464_v24 = vld [vmem:[%s1833_s27 + $0x6e0] sm:$0xff] }
  0x8b   : > { %1382 = vmatprep.subr.mxu1 %v431_v25  ;;  %1348 = vmatpush3.msra.mxu0 %v383_v26  ;;  %v481_v23 = vld [vmem:[%s1833_s27 + $0x768] sm:$0xff]  ;;  %v496_v25 = vld [vmem:[%s1833_s27 + $0x7e0] sm:$0xff] }
  0x8c   : > { %1383 = vmatpush3.msra.mxu1 %v415_v27  ;;  %1349 = vmatprep.subr.mxu0 %v398_v28  ;;  %v448_v26 = vld [vmem:[%s1833_s27 + $0x660] sm:$0xff]  ;;  %v463_v28 = vld [vmem:[%s1833_s27 + $0x6d8] sm:$0xff] }
  0x8d   : > { %1384 = vmatprep.subr.mxu1 %v430_v29  ;;  %1350 = vmatpush3.msra.mxu0 %v382_v30  ;;  %v480_v27 = vld [vmem:[%s1833_s27 + $0x760] sm:$0xff]  ;;  %v495_v29 = vld [vmem:[%s1833_s27 + $0x7d8] sm:$0xff] }
  0x8e   : > { %1385 = vmatpush3.msra.mxu1 %v414_v31  ;;  %1351 = vmatprep.subr.mxu0 %v397_v32  ;;  %v447_v30 = vld [vmem:[%s1833_s27 + $0x658] sm:$0xff]  ;;  %v462_v32 = vld [vmem:[%s1833_s27 + $0x6d0] sm:$0xff] }
  0x8f   : > { %1386 = vmatprep.subr.mxu1 %v429_v33  ;;  %1352 = vmatpush3.msra.mxu0 %v381_v34  ;;  %v479_v31 = vld [vmem:[%s1833_s27 + $0x758] sm:$0xff]  ;;  %v494_v33 = vld [vmem:[%s1833_s27 + $0x7d0] sm:$0xff] }
  0x90   : > { %1387 = vmatpush3.msra.mxu1 %v413_v35  ;;  %1353 = vmatprep.subr.mxu0 %v396_v36  ;;  %v446_v34 = vld [vmem:[%s1833_s27 + $0x650] sm:$0xff]  ;;  %v461_v36 = vld [vmem:[%s1833_s27 + $0x6c8] sm:$0xff] }
  0x91   : > { %1388 = vmatprep.subr.mxu1 %v428_v37  ;;  %1354 = vmatpush3.msra.mxu0 %v380_v38  ;;  %v478_v35 = vld [vmem:[%s1833_s27 + $0x750] sm:$0xff]  ;;  %v493_v37 = vld [vmem:[%s1833_s27 + $0x7c8] sm:$0xff] }
  0x92   : > { %1389 = vmatpush3.msra.mxu1 %v412_v39  ;;  %1355 = vmatprep.subr.mxu0 %v395_v40  ;;  %v445_v38 = vld [vmem:[%s1833_s27 + $0x648] sm:$0xff]  ;;  %v460_v40 = vld [vmem:[%s1833_s27 + $0x6c0] sm:$0xff] }
  0x93   : > { %1390 = vmatprep.subr.mxu1 %v427_v41  ;;  %1356 = vmatpush3.msra.mxu0 %v379_v42  ;;  %v477_v39 = vld [vmem:[%s1833_s27 + $0x748] sm:$0xff]  ;;  %v492_v41 = vld [vmem:[%s1833_s27 + $0x7c0] sm:$0xff] }
  0x94   : > { %1391 = vmatpush3.msra.mxu1 %v411_v43  ;;  %1357 = vmatprep.subr.mxu0 %v394_v44  ;;  %v444_v42 = vld [vmem:[%s1833_s27 + $0x640] sm:$0xff]  ;;  %v459_v44 = vld [vmem:[%s1833_s27 + $0x6b8] sm:$0xff] }
  0x95   : > { %1392 = vmatprep.subr.mxu1 %v426_v45  ;;  %1358 = vmatpush3.msra.mxu0 %v378_v46  ;;  %v476_v43 = vld [vmem:[%s1833_s27 + $0x740] sm:$0xff]  ;;  %v491_v45 = vld [vmem:[%s1833_s27 + $0x7b8] sm:$0xff] }
  0x96   : > { %1393 = vmatpush3.msra.mxu1 %v410_v47  ;;  %1359 = vmatprep.subr.mxu0 %v393_v48  ;;  %v443_v46 = vld [vmem:[%s1833_s27 + $0x638] sm:$0xff]  ;;  %v458_v48 = vld [vmem:[%s1833_s27 + $0x6b0] sm:$0xff] }
  0x97   : > { %1394 = vmatprep.subr.mxu1 %v425_v49  ;;  %1360 = vmatpush3.msra.mxu0 %v377_v50  ;;  %v475_v47 = vld [vmem:[%s1833_s27 + $0x738] sm:$0xff]  ;;  %v490_v49 = vld [vmem:[%s1833_s27 + $0x7b0] sm:$0xff] }
  0x98   : > { %1395 = vmatpush3.msra.mxu1 %v409_v51  ;;  %1361 = vmatprep.subr.mxu0 %v392_v52  ;;  %v442_v50 = vld [vmem:[%s1833_s27 + $0x630] sm:$0xff]  ;;  %v457_v52 = vld [vmem:[%s1833_s27 + $0x6a8] sm:$0xff] }
  0x99   : > { %1396 = vmatprep.subr.mxu1 %v424_v53  ;;  %1362 = vmatpush3.msra.mxu0 %v376_v54  ;;  %v474_v51 = vld [vmem:[%s1833_s27 + $0x730] sm:$0xff]  ;;  %v489_v53 = vld [vmem:[%s1833_s27 + $0x7a8] sm:$0xff] }
  0x9a   : > { %1397 = vmatpush3.msra.mxu1 %v408_v55  ;;  %1363 = vmatprep.subr.mxu0 %v391_v56  ;;  %v441_v54 = vld [vmem:[%s1833_s27 + $0x628] sm:$0xff]  ;;  %v456_v56 = vld [vmem:[%s1833_s27 + $0x6a0] sm:$0xff] }
  0x9b   : > { %1398 = vmatprep.subr.mxu1 %v423_v57  ;;  %1364 = vmatpush3.msra.mxu0 %v375_v58  ;;  %v473_v55 = vld [vmem:[%s1833_s27 + $0x728] sm:$0xff]  ;;  %v488_v57 = vld [vmem:[%s1833_s27 + $0x7a0] sm:$0xff] }
  0x9c   : > { %1399 = vmatpush3.msra.mxu1 %v407_v59  ;;  %1365 = vmatprep.subr.mxu0 %v390_v60  ;;  %v440_v58 = vld [vmem:[%s1833_s27 + $0x620] sm:$0xff]  ;;  %v455_v60 = vld [vmem:[%s1833_s27 + $0x698] sm:$0xff] }
  0x9d   : > { %1400 = vmatprep.subr.mxu1 %v422_v61  ;;  %1366 = vmatpush3.msra.mxu0 %v374_v62  ;;  %v472_v59 = vld [vmem:[%s1833_s27 + $0x720] sm:$0xff]  ;;  %v487_v61 = vld [vmem:[%s1833_s27 + $0x798] sm:$0xff] }
  0x9e   : > { %1401 = vmatpush3.msra.mxu1 %v406_v63  ;;  %1367 = vmatprep.subr.mxu0 %v389_v0  ;;  %v439_v62 = vld [vmem:[%s1833_s27 + $0x618] sm:$0xff]  ;;  %v454_v0 = vld [vmem:[%s1833_s27 + $0x690] sm:$0xff] }
  0x9f   : > { %1402 = vmatprep.subr.mxu1 %v421_v1  ;;  %1368 = vmatpush3.msra.mxu0 %v373_v2  ;;  %v471_v63 = vld [vmem:[%s1833_s27 + $0x718] sm:$0xff]  ;;  %v486_v1 = vld [vmem:[%s1833_s27 + $0x790] sm:$0xff] }
  0xa0   : > { %1403 = vmatpush3.msra.mxu1 %v405_v3  ;;  %1369 = vmatprep.subr.mxu0 %v388_v4  ;;  %v438_v2 = vld [vmem:[%s1833_s27 + $0x610] sm:$0xff]  ;;  %v453_v4 = vld [vmem:[%s1833_s27 + $0x688] sm:$0xff] }
  0xa1   : > { %1404 = vmatprep.subr.mxu1 %v420_v5  ;;  %1370 = vmatpush3.msra.mxu0 %v372_v6  ;;  %v470_v3 = vld [vmem:[%s1833_s27 + $0x710] sm:$0xff]  ;;  %v485_v5 = vld [vmem:[%s1833_s27 + $0x788] sm:$0xff] }
  0xa2   : > { %844 = vmatprep.mubr.f32.mxu0 %v237_v7  ;;  %1405 = vmatpush3.msra.mxu1 %v404_v8  ;;  %v437_v6 = vld [vmem:[%s1833_s27 + $0x608] sm:$0xff]  ;;  %v452_v8 = vld [vmem:[%s1833_s27 + $0x680] sm:$0xff] }
  0xa3   : > { %845 = vmatmul.mubr.f32.vlgmr.msra.gmra.mxu0 %v236_v9  ;;  %914 = vmatprep.mubr.f32.mxu1 %v239_v10  ;;  %v469_v7 = vld [vmem:[%s1833_s27 + $0x708] sm:$0xff]  ;;  %v484_v9 = vld [vmem:[%s1833_s27 + $0x780] sm:$0xff] }
  0xa4   : > { %1409 = vmatprep.subr.mxu0 %v467_v11  ;;  %1444 = vmatprep.subr.mxu1 %v499_v12  ;;  %v436_v10 = vld [vmem:[%s1833_s27 + $0x600] sm:$0xff]  ;;  %v241_v11 = vld [vmem:[%s1825_s26 + $0x68] sm:$0xff] }
  0xa5   : > { %915 = vmatmul.mubr.f32.vlgmr.msra.gmra.mxu1 %v238_v13  ;;  %1410 = vmatpush3.msra.mxu0 %v451_v14  ;;  %v468_v12 = vld [vmem:[%s1833_s27 + $0x700] sm:$0xff]  ;;  %v243_v13 = vld [vmem:[%s1825_s26 + $0x78] sm:$0xff] }
  0xa6   : > { %1445 = vmatpush3.msra.mxu1 %v483_v15  ;;  %1411 = vmatprep.subr.mxu0 %v466_v16  ;;  %v240_v14 = vld [vmem:[%s1825_s26 + $0x60] sm:$0xff]  ;;  %v242_v15 = vld [vmem:[%s1825_s26 + $0x70] sm:$0xff] }
  0xa7   : > { %1446 = vmatprep.subr.mxu1 %v498_v17  ;;  %1412 = vmatpush3.msra.mxu0 %v450_v18 }
  0xa8   : > { %1447 = vmatpush3.msra.mxu1 %v482_v19  ;;  %1413 = vmatprep.subr.mxu0 %v465_v20 }
  0xa9   : > { %1448 = vmatprep.subr.mxu1 %v497_v21  ;;  %1414 = vmatpush3.msra.mxu0 %v449_v22 }
  0xaa   : > { %1449 = vmatpush3.msra.mxu1 %v481_v23  ;;  %1415 = vmatprep.subr.mxu0 %v464_v24 }
  0xab   : > { %1450 = vmatprep.subr.mxu1 %v496_v25  ;;  %1416 = vmatpush3.msra.mxu0 %v448_v26 }
  0xac   : > { %1451 = vmatpush3.msra.mxu1 %v480_v27  ;;  %1417 = vmatprep.subr.mxu0 %v463_v28 }
  0xad   : > { %1452 = vmatprep.subr.mxu1 %v495_v29  ;;  %1418 = vmatpush3.msra.mxu0 %v447_v30 }
  0xae   : > { %1453 = vmatpush3.msra.mxu1 %v479_v31  ;;  %1419 = vmatprep.subr.mxu0 %v462_v32 }
  0xaf   : > { %1454 = vmatprep.subr.mxu1 %v494_v33  ;;  %1420 = vmatpush3.msra.mxu0 %v446_v34 }
  0xb0   : > { %1455 = vmatpush3.msra.mxu1 %v478_v35  ;;  %1421 = vmatprep.subr.mxu0 %v461_v36 }
  0xb1   : > { %1456 = vmatprep.subr.mxu1 %v493_v37  ;;  %1422 = vmatpush3.msra.mxu0 %v445_v38 }
  0xb2   : > { %1457 = vmatpush3.msra.mxu1 %v477_v39  ;;  %1423 = vmatprep.subr.mxu0 %v460_v40 }
  0xb3   : > { %1458 = vmatprep.subr.mxu1 %v492_v41  ;;  %1424 = vmatpush3.msra.mxu0 %v444_v42 }
  0xb4   : > { %1459 = vmatpush3.msra.mxu1 %v476_v43  ;;  %1425 = vmatprep.subr.mxu0 %v459_v44 }
  0xb5   : > { %1460 = vmatprep.subr.mxu1 %v491_v45  ;;  %1426 = vmatpush3.msra.mxu0 %v443_v46 }
  0xb6   : > { %1461 = vmatpush3.msra.mxu1 %v475_v47  ;;  %1427 = vmatprep.subr.mxu0 %v458_v48 }
  0xb7   : > { %1462 = vmatprep.subr.mxu1 %v490_v49  ;;  %1428 = vmatpush3.msra.mxu0 %v442_v50 }
  0xb8   : > { %1463 = vmatpush3.msra.mxu1 %v474_v51  ;;  %1429 = vmatprep.subr.mxu0 %v457_v52 }
  0xb9   : > { %1464 = vmatprep.subr.mxu1 %v489_v53  ;;  %1430 = vmatpush3.msra.mxu0 %v441_v54 }
  0xba   : > { %1465 = vmatpush3.msra.mxu1 %v473_v55  ;;  %1431 = vmatprep.subr.mxu0 %v456_v56 }
  0xbb   : > { %1466 = vmatprep.subr.mxu1 %v488_v57  ;;  %1432 = vmatpush3.msra.mxu0 %v440_v58 }
  0xbc   : > { %1467 = vmatpush3.msra.mxu1 %v472_v59  ;;  %1433 = vmatprep.subr.mxu0 %v455_v60 }
  0xbd   : > { %1468 = vmatprep.subr.mxu1 %v487_v61  ;;  %1434 = vmatpush3.msra.mxu0 %v439_v62 }
  0xbe   : > { %1469 = vmatpush3.msra.mxu1 %v471_v63  ;;  %1435 = vmatprep.subr.mxu0 %v454_v0 }
  0xbf   : > { %1470 = vmatprep.subr.mxu1 %v486_v1  ;;  %1436 = vmatpush3.msra.mxu0 %v438_v2 }
  0xc0   : > { %1471 = vmatpush3.msra.mxu1 %v470_v3  ;;  %1437 = vmatprep.subr.mxu0 %v453_v4 }
  0xc1   : > { %1472 = vmatprep.subr.mxu1 %v485_v5  ;;  %1438 = vmatpush3.msra.mxu0 %v437_v6 }
  0xc2   : > { %1473 = vmatpush3.msra.mxu1 %v469_v7  ;;  %1439 = vmatprep.subr.mxu0 %v452_v8 }
  0xc3   : > { %1474 = vmatprep.subr.mxu1 %v484_v9  ;;  %1440 = vmatpush3.msra.mxu0 %v436_v10 }
  0xc4   : > { %984 = vmatprep.mubr.f32.mxu0 %v241_v11  ;;  %1475 = vmatpush3.msra.mxu1 %v468_v12 }
  0xc5   : > { %1054 = vmatprep.mubr.f32.mxu1 %v243_v13  ;;  %985 = vmatmul.mubr.f32.vlgmr.msra.gmra.mxu0 %v240_v14 }
  0xc6   : > { %1055 = vmatmul.mubr.f32.vlgmr.msra.gmra.mxu1 %v242_v15 }
 0x11f   : > { %v1231_v16 = vpop.f32.mrf.mxu0 }
 0x120   : > { %v1266_v17 = vpop.f32.mrf.mxu1 }
 0x121   : > { %v1232_v18 = vpop.f32.mrf.mxu0 }
 0x122   : > { %v1267_v20 = vpop.f32.mrf.mxu1  ;;  %v1233_v23 = vadd.f32 %v1232_v18, %v1231_v16 }
 0x123   : > { %v1268_v24 = vadd.f32 %v1267_v20, %v1266_v17 }
 0x125   : > { %v637_v28 = vadd.f32 %v1268_v24, %v1233_v23 }
 0x141   : > { %v1301_v19 = vpop.f32.mrf.mxu0 }
 0x143   : > { %v1336_v21 = vpop.f32.mrf.mxu1  ;;  %v1302_v22 = vpop.f32.mrf.mxu0 }
 0x144   : > { %v1303_v26 = vadd.f32 %v1302_v22, %v1301_v19 }
 0x145   : > { %v1337_v27 = vpop.f32.mrf.mxu1 }
 0x146   : > { %v707_v31 = vadd.f32 %v1303_v26, %v637_v28  ;;  %v1338_v32 = vadd.f32 %v1337_v27, %v1336_v21 }
 0x148   : > { %v777_v35 = vadd.f32 %v1338_v32, %v707_v31 }
 0x163   : > { %v1371_v25 = vpop.f32.mrf.mxu0 }
 0x165   : > { %v1406_v29 = vpop.f32.mrf.mxu1  ;;  %v1372_v30 = vpop.f32.mrf.mxu0 }
 0x166   : > { %v1373_v33 = vadd.f32 %v1372_v30, %v1371_v25 }
 0x167   : > { %v1407_v34 = vpop.f32.mrf.mxu1 }
 0x168   : > { %v847_v36 = vadd.f32 %v1373_v33, %v777_v35  ;;  %v1408_v37 = vadd.f32 %v1407_v34, %v1406_v29 }
 0x16a   : > { %v917_v42 = vadd.f32 %v1408_v37, %v847_v36 }
 0x185   : > { %v1441_v38 = vpop.f32.mrf.mxu0 }
 0x186   : > { %v1476_v39 = vpop.f32.mrf.mxu1 }
 0x187   : > { %v1442_v40 = vpop.f32.mrf.mxu0 }
 0x188   : > { %v1477_v41 = vpop.f32.mrf.mxu1  ;;  %v1443_v43 = vadd.f32 %v1442_v40, %v1441_v38 }
 0x189   : > { %v1478_v45 = vadd.f32 %v1477_v41, %v1476_v39 }
 0x18a   : > { %v987_v44 = vadd.f32 %v1443_v43, %v917_v42 }
 0x18c   : > { %v1057_v46 = vadd.f32 %v1478_v45, %v987_v44 }
 0x18e   : > { %1061 = vst [vmem:[%s217_s29] sm:$0xff] %v1057_v46 }
 0x18f   : > { %1618 = shalt.err (!%p1615_p6)
}
 0x190   : > { %s1619_s12 = scalar_lea.hbm %s1074_s30, 128  ;;  %s1623_s26 = scalar_lea.hbm %s2154_s2, 256 }
 0x191   : > { %p1620_p7 = scmp.ne.s32.totalorder %s1074_s30, %s1619_s12  ;;  %p1624_p4 = scmp.lt.s32.totalorder %s1074_s30, %s2154_s2 }
 0x192   : > { %p1625_p10 = scmp.lt.s32.totalorder %s1623_s26, %s1619_s12 }
 0x193   : > { %p1621_p1 = pnand %p1620_p7, %p1762_p9 }
 0x194   : > { %p1626_p8 = por %p1625_p10, %p1624_p4 }
 0x195   : > { %p1622_p2 = pneg %p1621_p1 }
 0x197   : > { %p1627_p0 = pnand %p1626_p8, %p1622_p2 }
 0x199   : > { %1630 = shalt.err (!%p1627_p0)
}
 0x19a   : > { %1483 = dma.vmem_to_hbm [thread:$0]  (%p1762_p9), %s1077_s3, 128, %s1074_s30, %s1063_s4  }
 0x19b PF: > { %s1088_s27 = sand.u32 1, %s1669_s9   ;;  %p2161_p3 = scmp.ge.s32.totalorder %s1689_s14, 2 }
 0x19c   : > { %s1089_s21 = scalar_lea.sflag [#allocation4], %s1088_s27 }
 0x19d   : > { %p1493_p13 = pnand %p2161_p3, %p1769_p11 }
 0x19f   : > { %p1494_p5 = pneg %p1493_p13 }
 0x1a1   : > { %1664 = dma.done.wait (%p1494_p5), %s1089_s21, 128  }
 0x1a2   : > { %1666 = vsyncadd (%p1494_p5), %s1089_s21, 4294967168  ;;  %s21_s14 = sadd.s32 1, %s1689_s14   ;;  %s2162_s9 = smov %s1673_s10 }
 0x1a3   : > { %p18_p12 = scmp.ge.s32.totalorder %s21_s14, 4   ;;  %s2163_s10 = smov %s1677_s11 }
 0x1a4   : > { %s2164_s11 = smov %s1767_s23  ;;  %s2165_s12 = smov %s1685_s13 }
 0x1a5   : > { %s2166_s13 = smov %s2168_s17  ;;  %20 = sbr.rel (!%p18_p12) target bundleno = 8 (0x8), region = 90 }
 0x1aa   :  { %1094 = vsyncpa [#allocation3], 1 }
 0x1ab   :  { %1096 = vsyncpa [#allocation3 + $0x1], 1 }
 0x1ac   :  { %1097 = vsyncpa [#allocation6], 1 }
 0x1ad   :  { %1099 = vsyncpa [#allocation6 + $0x1], 1 }
 0x1ae   :  { %1100 = vsyncpa [#allocation4], 1 }
 0x1af   :  { %1102 = vsyncpa [#allocation4 + $0x1], 1 }

</bundles_post_ra>
